<compile_context>
chip_gen: v7x
topology: tpu7x:2x2x1
jax: 0.10.0
libtpu: 0.0.40
codegen_flags: <defaults>
</compile_context>

<pallas_src>
import jax
import jax.numpy as jnp
from jax.experimental import pallas as pl
from jax.experimental.pallas import tpu as pltpu


_DMA_DEPTH = 8                    # outstanding row-gather DMAs per block
_VMEM_BUDGET = 8 * 1024 * 1024    # budget for the double-buffered (T, D) tile


def _round_up(x, m):
    return (x + m - 1) // m * m


# ---------------------------------------------------------------------------
# Path 2: blocked DMA gather (table in HBM, rows DMA'd into the output tile).
# ---------------------------------------------------------------------------
def _embedding_gather_kernel(ids_ref, table_hbm, out_ref, sem):
    T = out_ref.shape[0]
    base = pl.program_id(0) * T

    def _wait_one(slot):
        # Dummy descriptor with the same (1, D) shape as every issued copy;
        # it only determines the byte count to wait for on sem[slot].
        pltpu.make_async_copy(
            table_hbm.at[pl.ds(0, 1), :],
            out_ref.at[pl.ds(0, 1), :],
            sem.at[slot]).wait()

    @pl.loop(0, T)
    def _issue(t):
        slot = t % _DMA_DEPTH

        # Keep at most _DMA_DEPTH copies in flight: before reusing a slot,
        # retire the copy issued _DMA_DEPTH iterations earlier.
        @pl.when(t >= _DMA_DEPTH)
        def _():
            _wait_one(slot)

        row = ids_ref[base + t]
        pltpu.make_async_copy(
            table_hbm.at[pl.ds(row, 1), :],   # HBM table row
            out_ref.at[pl.ds(t, 1), :],       # straight into the output tile
            sem.at[slot]).start()

    # Drain the copies still in flight.
    @pl.loop(0, min(T, _DMA_DEPTH))
    def _drain(s):
        _wait_one(s)


# ---------------------------------------------------------------------------
# Path 1: one-hot matmul on the MXU (whole table resident in VMEM).
# ---------------------------------------------------------------------------
def _embedding_onehot_kernel(ids_ref, table_ref, out_ref):
    T = out_ref.shape[0]
    V = table_ref.shape[0]
    ids_col = ids_ref[...]                                    # (T, 1) int32
    vocab = jax.lax.broadcasted_iota(jnp.int32, (T, V), 1)    # (T, V)
    one_hot = (ids_col == vocab).astype(table_ref.dtype)      # (T, V)
    out_ref[...] = jnp.dot(
        one_hot, table_ref[...],
        preferred_element_type=jnp.float32,
        precision=jax.lax.Precision.HIGHEST,
    ).astype(out_ref.dtype)


# ---------------------------------------------------------------------------
# Wrapper
# ---------------------------------------------------------------------------
def embedding_forward(ids, table, *, block_tokens=256, use_onehot=None):
    """ids: (B, S) int, table: (V, D) -> (B, S, D) in table.dtype."""
    B, S = ids.shape
    V, D = table.shape
    n_tok = B * S

    # Clamp so a bad id can never drive an out-of-bounds DMA.
    # TODO(synk): padding_idx / max_norm / sparse-grad options of nn.Embedding
    # are not implemented (plain forward only).
    ids_flat = jnp.clip(ids.reshape(n_tok).astype(jnp.int32), 0, V - 1)

    # T tokens per grid step: sublane-aligned (multiple of 8), capped so the
    # double-buffered (T, D) output tile stays well inside scoped VMEM.
    bytes_per_row = D * table.dtype.itemsize
    t_cap = max(8, (_VMEM_BUDGET // (2 * bytes_per_row)) // 8 * 8)
    T = int(max(8, min(block_tokens, t_cap, _round_up(n_tok, 8))))
    n_pad = _round_up(n_tok, T)
    if n_pad != n_tok:
        ids_flat = jnp.pad(ids_flat, (0, n_pad - n_tok))
    n_blocks = n_pad // T

    if use_onehot is None:
        use_onehot = (V <= 2048) and (V * D * table.dtype.itemsize <= 4 * 1024 * 1024)

    if use_onehot:
        out_flat = pl.pallas_call(
            _embedding_onehot_kernel,
            out_shape=jax.ShapeDtypeStruct((n_pad, D), table.dtype),
            grid=(n_blocks,),
            in_specs=[
                pl.BlockSpec((T, 1), lambda i: (i, 0)),    # ids as a column
                pl.BlockSpec((V, D), lambda i: (0, 0)),    # whole table, resident
            ],
            out_specs=pl.BlockSpec((T, D), lambda i: (i, 0)),
            compiler_params=pltpu.CompilerParams(
                dimension_semantics=("parallel",)),
        )(ids_flat.reshape(n_pad, 1), table)
    else:
        # TODO(synk): for n_tok >~ 100K, chunk ids with an outer wrapper loop to
        # bound the SMEM scalar-prefetch array size.
        out_flat = pl.pallas_call(
            _embedding_gather_kernel,
            out_shape=jax.ShapeDtypeStruct((n_pad, D), table.dtype),
            grid_spec=pltpu.PrefetchScalarGridSpec(
                num_scalar_prefetch=1,
                grid=(n_blocks,),
                in_specs=[pl.BlockSpec(memory_space=pl.ANY)],   # table in HBM
                out_specs=pl.BlockSpec((T, D), lambda i, ids: (i, 0)),
                scratch_shapes=[pltpu.SemaphoreType.DMA((_DMA_DEPTH,))],
            ),
            compiler_params=pltpu.CompilerParams(
                dimension_semantics=("parallel",)),
        )(ids_flat, table)

    return out_flat[:n_tok].reshape(B, S, D)


if __name__ == "__main__":
    vocab_size = 64
    embed_dim = 32
    batch = 2
    seq = 8

    key = jax.random.PRNGKey(0)
    k_table, k_ids = jax.random.split(key)

    # nn.Embedding weight ~ N(0, 1), fp32 (kept fp32 to match PyTorch numerics).
    table = jax.random.normal(k_table, (vocab_size, embed_dim), dtype=jnp.float32)
    ids = jax.random.randint(k_ids, (batch, seq), 0, vocab_size, dtype=jnp.int32)

    ref = jnp.take(table, ids, axis=0)

    # Path 1 (auto-selected for this small vocab): one-hot @ table on the MXU.
    out_onehot = jax.block_until_ready(embedding_forward(ids, table))
    assert out_onehot.shape == (batch, seq, embed_dim)
    assert jnp.allclose(out_onehot, ref, rtol=1e-5, atol=1e-5), \
        "one-hot path mismatch vs reference"

    # Path 2 (forced): blocked HBM->VMEM DMA gather (used for large vocab).
    out_gather = jax.block_until_ready(
        embedding_forward(ids, table, use_onehot=False))
    assert out_gather.shape == (batch, seq, embed_dim)
    assert jnp.allclose(out_gather, ref), "gather path mismatch vs reference"

    print("KERNEL_OK")
</pallas_src>

<mosaic_0001>
module attributes {stable_mosaic.version = 11 : i64} {
  func.func @_embedding_onehot_kernel(%arg0: i32, %arg1: memref<16x1xi32, #tpu.memory_space<vmem>>, %arg2: memref<64x32xf32, #tpu.memory_space<vmem>>, %arg3: memref<16x32xf32, #tpu.memory_space<vmem>>) attributes {dimension_semantics = [#tpu.dimension_semantics<parallel>], iteration_bounds = array<i64: 1>, scalar_prefetch = 0 : i64, scratch_operands = 0 : i64, tpu.core_type = #tpu.core_type<tc>, window_params = [{transform_indices = @transform_0, window_bounds = array<i64: 16, 1>}, {pipeline_mode = #tpu.pipeline_mode<synchronous>, transform_indices = @transform_1, window_bounds = array<i64: 64, 32>}, {transform_indices = @transform_2, window_bounds = array<i64: 16, 32>}]} {
    %c0 = arith.constant 0 : index
    %c0_0 = arith.constant 0 : index
    %0 = vector.load %arg1[%c0, %c0_0] : memref<16x1xi32, #tpu.memory_space<vmem>>, vector<16x1xi32>
    %1 = tpu.iota {dimensions = array<i32: 1>} : vector<16x64xi32>
    %2 = vector.broadcast %0 : vector<16x1xi32> to vector<16x64xi32>
    %3 = arith.cmpi eq, %2, %1 : vector<16x64xi32>
    %4 = arith.extui %3 : vector<16x64xi1> to vector<16x64xi32>
    %5 = arith.sitofp %4 : vector<16x64xi32> to vector<16x64xf32>
    %c0_1 = arith.constant 0 : index
    %c0_2 = arith.constant 0 : index
    %6 = vector.load %arg2[%c0_1, %c0_2] : memref<64x32xf32, #tpu.memory_space<vmem>>, vector<64x32xf32>
    %cst = arith.constant dense<0.000000e+00> : vector<16x32xf32>
    %7 = tpu.matmul %5, %6, %cst {dimension_numbers = #tpu.dot_dimension_numbers<[1], [0], [0], [1], [0, 0, 1, 1], [], []>, precision = #tpu.contract_precision<fp32>} : vector<16x64xf32>, vector<64x32xf32>, vector<16x32xf32> -> vector<16x32xf32>
    %c0_3 = arith.constant 0 : index
    %c0_4 = arith.constant 0 : index
    %8 = vector.load %arg3[%c0_3, %c0_4] : memref<16x32xf32, #tpu.memory_space<vmem>>, vector<16x32xf32>
    tpu.vector_store %arg3[%c0_3, %c0_4], %7 {strides = array<i32>} : memref<16x32xf32, #tpu.memory_space<vmem>>, vector<16x32xf32>,
    return
  }
  func.func @transform_0(%arg0: i32) -> (i32, i32) {
    %c0_i32 = arith.constant 0 : i32
    %c0_i32_0 = arith.constant 0 : i32
    return %arg0, %c0_i32 : i32, i32
  }
  func.func @transform_1(%arg0: i32) -> (i32, i32) {
    %c0_i32 = arith.constant 0 : i32
    %c0_i32_0 = arith.constant 0 : i32
    %c0_i32_1 = arith.constant 0 : i32
    return %c0_i32, %c0_i32_0 : i32, i32
  }
  func.func @transform_2(%arg0: i32) -> (i32, i32) {
    %c0_i32 = arith.constant 0 : i32
    %c0_i32_0 = arith.constant 0 : i32
    return %arg0, %c0_i32 : i32, i32
  }
}

</mosaic_0001>

<bundles_post_ra>
// kernel: tpu_custom_call.1
= control target key start
LH: loop header
LB: loop body
LE: loop exit
PB: predicated region body
PF: predicated region fallthrough
CT: control target
= control target key end

     0   :  { %v960_v2 = vmov 0   ;;  %s1066_s0 = inlined_call_operand.vmem [shape: s32[16,1], index: 0, kind: input, shape index: {}]   ;;  %s1067_s1 = inlined_call_operand.vmem [shape: f32[64,32], index: 1, kind: input, shape index: {}]   ;;  %s1068_s2 = inlined_call_operand.hbm [shape: f32[16,32], index: 2, kind: output, shape index: {}]  }
   0x1   :  { %v12_v0 = vld [vmem:[%s1066_s0] sm:$0xff]  ;;  %935 = vset.pattern.permute.xlu0 %v960_v2  ;;  %v29_v3 = vld [vmem:[%s1067_s1 + $0x8] sm:$0xff]  ;;  %v30_v5 = vld [vmem:[%s1067_s1 + $0x10] sm:$0xff] }
   0x2   :  { %v28_v1 = vld [vmem:[%s1067_s1] sm:$0xff]  ;;  %v31_v6 = vld [vmem:[%s1067_s1 + $0x18] sm:$0xff]  ;;  %17 = vperm.xlu0 %935, %v12_v0   ;;  %v47_v7 = vand.u32 4294901760, %v29_v3  ;;  %v50_v8 = vand.u32 4294901760, %v30_v5  ;;  %v33_v11 = vld [vmem:[%s1067_s1 + $0x28] sm:$0xff] }
   0x3   :  { %v44_v4 = vand.u32 4294901760, %v28_v1  ;;  %v53_v9 = vand.u32 4294901760, %v31_v6  ;;  %v32_v10 = vld [vmem:[%s1067_s1 + $0x20] sm:$0xff]  ;;  %v13_v12 = vld [vmem:[%s1066_s0 + $0x8] sm:$0xff] }
   0x4   :  { %7 = vsyncpa [#allocation3], 0  ;;  %v56_v15 = vand.u32 4294901760, %v32_v10  ;;  %v59_v16 = vand.u32 4294901760, %v33_v11  ;;  %v34_v17 = vld [vmem:[%s1067_s1 + $0x30] sm:$0xff]  ;;  %v35_v18 = vld [vmem:[%s1067_s1 + $0x38] sm:$0xff]  ;;  %v145_v20 = vsub.f32 %v29_v3, %v47_v7  ;;  %v152_v28 = vsub.f32 %v30_v5, %v50_v8 }
   0x5   :  { %v1004_v13 = vpack.c.bf16 %v47_v7, %v44_v4  ;;  %v1006_v14 = vpack.c.bf16 %v53_v9, %v50_v8  ;;  %v138_v19 = vsub.f32 %v28_v1, %v44_v4  ;;  %v62_v21 = vand.u32 4294901760, %v34_v17  ;;  %s962_s0 = smov [#allocation2]  }
   0x6   :  { %20 = vperm.xlu0 %935, %v13_v12   ;;  %v1019_v22 = vpack.c.bf16 %v59_v16, %v56_v15  ;;  %v65_v23 = vand.u32 4294901760, %v35_v18  ;;  %v146_v25 = vand.u32 4294901760, %v145_v20  ;;  %v159_v29 = vsub.f32 %v31_v6, %v53_v9  ;;  %s631_s1 = sshll.u32 %s962_s0, 4  ;;  %s632_s1 = int_to_ptr.vmem [resolvable:$true] %s631_s1 }
   0x7   :  { %873 = vmatprep.subr.bf16.mxu0 %v1004_v13  ;;  %825 = vmatprep.subr.bf16.mxu1 %v1004_v13  ;;  %v139_v24 = vand.u32 4294901760, %v138_v19  ;;  %v153_v33 = vand.u32 4294901760, %v152_v28  ;;  %v166_v39 = vsub.f32 %v32_v10, %v56_v15  ;;  %v173_v40 = vsub.f32 %v33_v11, %v59_v16  ;;  %s936_s29 = scalar_lea.vmem %s632_s1, 256  ;;  %p941_p1 = scmp.lt.s32.totalorder %s632_s1, %s632_s1 }
   0x8   :  { %875 = vmatpush3.bf16.msra.mxu0 %v1004_v13  ;;  %827 = vmatpush3.bf16.msra.mxu1 %v1004_v13  ;;  %v147_v27 = vsub.f32 %v145_v20, %v146_v25  ;;  %v1025_v30 = vpack.c.bf16 %v65_v23, %v62_v21  ;;  %v160_v34 = vand.u32 4294901760, %v159_v29  ;;  %v180_v47 = vsub.f32 %v34_v17, %v62_v21  ;;  %p937_p0 = scmp.ne.s32.totalorder %s632_s1, %s936_s29  ;;  %p942_p2 = scmp.lt.s32.totalorder %s936_s29, %s936_s29 }
   0x9   :  { %877 = vmatprep.subr.bf16.mxu0 %v1006_v14  ;;  %829 = vmatprep.subr.bf16.mxu1 %v1006_v14  ;;  %v140_v26 = vsub.f32 %v138_v19, %v139_v24  ;;  %v154_v36 = vsub.f32 %v152_v28, %v153_v33  ;;  %v888_v38 = vpack.c.bf16 %v146_v25, %v139_v24  ;;  %v167_v44 = vand.u32 4294901760, %v166_v39 }
   0xa   :  { %v148_v32 = vand.u32 4294901760, %v147_v27  ;;  %v1029_v35 = vpack.c.bf16 %v160_v34, %v153_v33  ;;  %v161_v37 = vsub.f32 %v159_v29, %v160_v34  ;;  %v174_v45 = vand.u32 4294901760, %v173_v40  ;;  %p943_p3 = por %p942_p2, %p941_p1 }
   0xb   :  { %v141_v31 = vand.u32 4294901760, %v140_v26  ;;  %v155_v42 = vand.u32 4294901760, %v154_v36  ;;  %v187_v48 = vsub.f32 %v35_v18, %v65_v23  ;;  %v168_v50 = vsub.f32 %v166_v39, %v167_v44 }
   0xc   :  { %879 = vmatpush3.bf16.msra.mxu0 %v1006_v14  ;;  %831 = vmatpush3.bf16.msra.mxu1 %v1006_v14  ;;  %v162_v43 = vand.u32 4294901760, %v161_v37  ;;  %v896_v49 = vpack.c.bf16 %v174_v45, %v167_v44  ;;  %v175_v51 = vsub.f32 %v173_v40, %v174_v45  ;;  %v181_v52 = vand.u32 4294901760, %v180_v47  ;;  %p944_p4 = pnand %p943_p3, %p937_p0 }
   0xd   :  { %881 = vmatprep.subr.bf16.mxu0 %v1019_v22  ;;  %833 = vmatprep.subr.bf16.mxu1 %v1019_v22  ;;  %v840_v41 = vpack.c.bf16 %v148_v32, %v141_v31  ;;  %v188_v53 = vand.u32 4294901760, %v187_v48  ;;  %v169_v54 = vand.u32 4294901760, %v168_v50  ;;  %v856_v63 = vpack.c.bf16 %v145_v20, %v138_v19 }
   0xe   :  { %v844_v46 = vpack.c.bf16 %v162_v43, %v155_v42  ;;  %v176_v55 = vand.u32 4294901760, %v175_v51  ;;  %v182_v57 = vsub.f32 %v180_v47, %v181_v52  ;;  %v860_v0 = vpack.c.bf16 %v159_v29, %v152_v28 }
   0xf   :  { %v900_v56 = vpack.c.bf16 %v188_v53, %v181_v52  ;;  %v189_v58 = vsub.f32 %v187_v48, %v188_v53  ;;  %v864_v1 = vpack.c.bf16 %v173_v40, %v166_v39  ;;  %v868_v2 = vpack.c.bf16 %v187_v48, %v180_v47 }
  0x10   :  { %883 = vmatpush3.bf16.msra.mxu0 %v1019_v22  ;;  %835 = vmatpush3.bf16.msra.mxu1 %v1019_v22  ;;  %v848_v59 = vpack.c.bf16 %v176_v55, %v169_v54  ;;  %v183_v60 = vand.u32 4294901760, %v182_v57  ;;  %v14_v3 = vlaneseq  ;;  %vm36_vm0 = vcmask 523264  }
  0x11   :  { %885 = vmatprep.subr.bf16.mxu0 %v1025_v30  ;;  %837 = vmatprep.subr.bf16.mxu1 %v1025_v30  ;;  %v190_v61 = vand.u32 4294901760, %v189_v58  ;;  %v961_v6 = vmov 0.0   ;;  %vm623_vm3 = vcmask 261120  }
  0x12   :  { %v15_v4 = vand.u32 127, %v14_v3 }
  0x13   :  { %v852_v62 = vpack.c.bf16 %v190_v61, %v183_v60 }
  0x14   :  { %887 = vmatpush3.bf16.msra.mxu0 %v1025_v30  ;;  %839 = vmatpush3.bf16.msra.mxu1 %v1025_v30 }
  0x15   :  { %889 = vmatprep.subr.bf16.mxu0 %v888_v38  ;;  %841 = vmatprep.subr.bf16.mxu1 %v840_v41 }
  0x81   :  { %v18_v5 = vpop.permute.xlu0 %17 }
  0x82   :  { %vm22_vm1 = vcmp.eq.s32.totalorder %v18_v5, %v15_v4 }
  0x83   :  { %v642_v7 = vsel %vm22_vm1, 1.0, %v961_v6 }
  0x84   :  { %v38_v8 = vsel %vm36_vm0, %v642_v7, 0 }
  0x85   :  { %v117_v9 = vsub.f32 %v38_v8, %v38_v8  ;;  %v21_v10 = vpop.permute.xlu0 %20 }
  0x86   :  { %vm23_vm2 = vcmp.eq.s32.totalorder %v21_v10, %v15_v4 }
  0x87   :  { %v643_v11 = vsel %vm23_vm2, 1.0, %v961_v6  ;;  %v118_v12 = vand.u32 4294901760, %v117_v9 }
  0x88   :  { %v41_v15 = vsel %vm36_vm0, %v643_v11, 0 }
  0x89   :  { %v127_v16 = vsub.f32 %v41_v15, %v41_v15  ;;  %783 = vmatprep.mubr.f32.mxu0 %v118_v12  ;;  %v119_v17 = vsub.f32 %v117_v9, %v118_v12 }
  0x8b   :  { %v120_v18 = vand.u32 4294901760, %v119_v17  ;;  %v128_v19 = vand.u32 4294901760, %v127_v16 }
  0x8d   :  { %726 = vmatprep.mubr.f32.mxu1 %v120_v18  ;;  %784 = vmatmul.mubr.f32.vlgmr.msra.gmra.mrb[0].mxu0 %v128_v19  ;;  %v129_v20 = vsub.f32 %v127_v16, %v128_v19 }
  0x8e   :  { %891 = vmatpush3.bf16.msra.mxu0 %v888_v38  ;;  %802 = vmatprep.mubr.msk.f32.mxu0 %vm36_vm0, %v642_v7 }
  0x8f   :  { %893 = vmatprep.subr.bf16.mxu0 %v1029_v35  ;;  %v130_v21 = vand.u32 4294901760, %v129_v20 }
  0x91   :  { %727 = vmatmul.mubr.f32.vlgmr.msra.gmra.mrb[0].mxu1 %v130_v21 }
  0x92   :  { %843 = vmatpush3.bf16.msra.mxu1 %v840_v41  ;;  %895 = vmatpush3.bf16.msra.mxu0 %v1029_v35 }
  0x93   :  { %745 = vmatprep.mubr.msk.f32.mxu1 %vm36_vm0, %v642_v7  ;;  %845 = vmatprep.subr.bf16.mxu1 %v844_v46 }
  0x94   :  { %897 = vmatprep.subr.bf16.mxu0 %v896_v49 }
  0x96   :  { %847 = vmatpush3.bf16.msra.mxu1 %v844_v46  ;;  %899 = vmatpush3.bf16.msra.mxu0 %v896_v49 }
  0x97   :  { %849 = vmatprep.subr.bf16.mxu1 %v848_v59  ;;  %901 = vmatprep.subr.bf16.mxu0 %v900_v56 }
  0x9a   :  { %851 = vmatpush3.bf16.msra.mxu1 %v848_v59  ;;  %903 = vmatpush3.bf16.msra.mxu0 %v900_v56 }
  0x9b   :  { %853 = vmatprep.subr.bf16.mxu1 %v852_v62  ;;  %905 = vmatprep.subr.bf16.mxu0 %v1004_v13 }
  0x9d   :  { %803 = vmatmul.mubr.msk.f32.vlgmr.msra.gmra.mrb[0].mxu0 %vm36_vm0, %v643_v11 }
  0x9e   :  { %855 = vmatpush3.bf16.msra.mxu1 %v852_v62  ;;  %907 = vmatpush3.bf16.msra.mxu0 %v1004_v13 }
  0x9f   :  { %821 = vmatprep.mubr.msk.f32.mxu0 %vm36_vm0, %v642_v7  ;;  %857 = vmatprep.subr.bf16.mxu1 %v856_v63 }
  0xa0   :  { %909 = vmatprep.subr.bf16.mxu0 %v1006_v14 }
  0xa1   :  { %746 = vmatmul.mubr.msk.f32.vlgmr.msra.gmra.mrb[0].mxu1 %vm36_vm0, %v643_v11 }
  0xa2   :  { %859 = vmatpush3.bf16.msra.mxu1 %v856_v63  ;;  %764 = vmatprep.mubr.f32.mxu1 %v117_v9 }
  0xa3   :  { %911 = vmatpush3.bf16.msra.mxu0 %v1006_v14  ;;  %861 = vmatprep.subr.bf16.mxu1 %v860_v0 }
  0xa4   :  { %913 = vmatprep.subr.bf16.mxu0 %v1019_v22 }
  0xa6   :  { %863 = vmatpush3.bf16.msra.mxu1 %v860_v0 }
  0xa7   :  { %915 = vmatpush3.bf16.msra.mxu0 %v1019_v22  ;;  %865 = vmatprep.subr.bf16.mxu1 %v864_v1 }
  0xa8   :  { %917 = vmatprep.subr.bf16.mxu0 %v1025_v30 }
  0xaa   :  { %867 = vmatpush3.bf16.msra.mxu1 %v864_v1 }
  0xab   :  { %919 = vmatpush3.bf16.msra.mxu0 %v1025_v30  ;;  %869 = vmatprep.subr.bf16.mxu1 %v868_v2 }
  0xae   :  { %822 = vmatmul.mubr.msk.f32.vlgmr.msra.gmra.mrb[0].mxu0 %vm36_vm0, %v643_v11  ;;  %871 = vmatpush3.bf16.msra.mxu1 %v868_v2 }
  0xb1   :  { %765 = vmatmul.mubr.f32.vlgmr.msra.gmra.mrb[0].mxu1 %v127_v16 }
 0x181   :  { %v823_v13 = vpop.f32.mrb[0].mxu0 }
 0x182   :  { %v613_v23 = vpop.f32.mrb[1].mxu0 }
 0x184   :  { %v766_v14 = vpop.f32.mrb[0].mxu1 }
 0x185   :  { %v920_v24 = vadd.f32 %v823_v13, %v766_v14  ;;  %v337_v25 = vpop.f32.mrb[1].mxu1 }
 0x186   :  { %v921_v22 = vadd.f32 %v613_v23, %v337_v25 }
 0x187   :  { %625 = vst.msk [vmem:[#allocation2 + $0x8] sm:$0xff] %vm623_vm3, %v920_v24 }
 0x188   :  { %624 = vst.msk [vmem:[#allocation2] sm:$0xff] %vm623_vm3, %v921_v22 }
 0x189   :  { %947 = shalt.err (!%p944_p4)
}
 0x18a   :  { %s948_s4 = scalar_lea.hbm %s1068_s2, 256 }
 0x18b   :  { %p949_p5 = scmp.ne.s32.totalorder %s1068_s2, %s948_s4  ;;  %p952_p6 = scmp.lt.u32.totalorder %s948_s4, %s1068_s2 }
 0x18d   :  { %p954_p7 = pnand %p952_p6, %p949_p5 }
 0x18f   :  { %957 = shalt.err (!%p954_p7)
}
 0x190   :  { %s963_s9 = smov 128   ;;  %s964_s10 = smov 8  }
 0x191   :  { %637 = dma.vmem_to_hbm [thread:$0]  %s632_s1, 256, %s1068_s2, [#allocation3], %s963_s9, %s963_s9, %s964_s10  }
 0x192   :  { %958 = dma.done.wait [#allocation3], 256  }
 0x193   :  { %959 = vsyncadd [#allocation3], 4294967040 }
 0x194   :  { %641 = vsyncpa [#allocation3], 1 }

</bundles_post_ra>
